<compile_context>
chip_gen: v7x
topology: tpu7x:2x2x1
jax: 0.10.0
libtpu: 0.0.40
codegen_flags: <defaults>
</compile_context>

<pallas_src>
import functools

import jax
import jax.numpy as jnp
from jax.experimental import pallas as pl
from jax.experimental.pallas import tpu as pltpu


def _layernorm_kernel(x_ref, alpha_ref, bias_ref, o_ref, *, eps, features):
    x = x_ref[...].astype(jnp.float32)            # (tm, H)
    alpha = alpha_ref[...].astype(jnp.float32)    # (1, H)
    bias = bias_ref[...].astype(jnp.float32)      # (1, H)

    mean = jnp.sum(x, axis=-1, keepdims=True) * (1.0 / features)   # (tm, 1)
    centered = x - mean
    # torch.std default: unbiased estimator (divide by H - 1)
    var = jnp.sum(centered * centered, axis=-1, keepdims=True) / (features - 1)
    std = jnp.sqrt(var)
    # Exact per-row reciprocal on the (tm, 1) column instead of a (tm, H) divide.
    inv = 1.0 / (std + eps)                                          # (tm, 1)
    out = (centered * inv) * alpha + bias
    o_ref[...] = out.astype(o_ref.dtype)


def _choose_row_tile(rows, hidden, itemsize, *, max_tile=1024,
                     vmem_budget_bytes=44 << 20):
    """Pick the largest row tile that keeps DMA buffers + f32 temps in budget."""
    # Sublane packing: f32 -> 8, bf16/f16 -> 16, 8-bit -> 32.
    pack = {4: 8, 2: 16, 1: 32}.get(itemsize, 8)
    # Per row of tile: double-buffered in + out blocks (native dtype) plus an
    # allowance of ~2 f32-width temporaries for the in-kernel compute.
    per_row_bytes = hidden * (4 * itemsize + 2 * 4)
    tile = max(pack, min(max_tile, vmem_budget_bytes // max(per_row_bytes, 1)))
    tile = max(pack, (tile // pack) * pack)
    # Never exceed the (pack-rounded) number of rows.
    rows_padded = -(-rows // pack) * pack
    tile = min(tile, rows_padded)
    return max(tile, pack), per_row_bytes


def layer_normalization(x, alpha, bias, eps=1e-6, row_tile=None):
    """x: (batch, seq_len, hidden); alpha, bias: (hidden,)."""
    batch, seq_len, hidden = x.shape
    rows = batch * seq_len
    x2d = x.reshape(rows, hidden)
    alpha2d = alpha.reshape(1, hidden)
    bias2d = bias.reshape(1, hidden)

    itemsize = jnp.dtype(x.dtype).itemsize
    auto_tile, per_row_bytes = _choose_row_tile(rows, hidden, itemsize)
    if row_tile is None:
        row_tile = auto_tile

    # Pad rows up to a multiple of row_tile if needed (glue in plain JAX).
    # Zero rows produce 0 / (0 + eps) = 0 (no NaN) and are sliced off below.
    pad = (-rows) % row_tile
    if pad:
        x2d = jnp.pad(x2d, ((0, pad), (0, 0)))
    padded_rows = x2d.shape[0]
    grid = (padded_rows // row_tile,)

    # Raise the scoped-VMEM limit to cover the chosen tile; keep it <= ~56 MiB so
    # the same config is safe on v7x's 64 MiB VMEM.
    vmem_limit = row_tile * per_row_bytes + 2 * hidden * 4 + (4 << 20)
    vmem_limit = int(min(max(vmem_limit, 32 << 20), 56 << 20))

    kernel = functools.partial(_layernorm_kernel, eps=eps, features=hidden)

    out2d = pl.pallas_call(
        kernel,
        out_shape=jax.ShapeDtypeStruct((padded_rows, hidden), x.dtype),
        grid_spec=pltpu.PrefetchScalarGridSpec(
            num_scalar_prefetch=0,
            grid=grid,
            in_specs=[
                pl.BlockSpec((row_tile, hidden), lambda i: (i, 0)),
                pl.BlockSpec((1, hidden), lambda i: (0, 0)),
                pl.BlockSpec((1, hidden), lambda i: (0, 0)),
            ],
            out_specs=pl.BlockSpec((row_tile, hidden), lambda i: (i, 0)),
        ),
        compiler_params=pltpu.CompilerParams(
            dimension_semantics=("parallel",),   # lets v7x shard rows across 2 TCs
            vmem_limit_bytes=vmem_limit,
        ),
    )(x2d, alpha2d, bias2d)

    if pad:
        out2d = out2d[:rows]
    return out2d.reshape(batch, seq_len, hidden)


def reference_layernorm(x, alpha, bias, eps=1e-6):
    mean = jnp.mean(x, axis=-1, keepdims=True)
    # unbiased std, matching torch.std default
    var = jnp.sum((x - mean) ** 2, axis=-1, keepdims=True) / (x.shape[-1] - 1)
    std = jnp.sqrt(var)
    return alpha * (x - mean) / (std + eps) + bias


if __name__ == "__main__":
    batch, seq_len, hidden = 2, 8, 32
    key = jax.random.PRNGKey(0)
    x = jax.random.normal(key, (batch, seq_len, hidden), dtype=jnp.float32)

    # Deterministic parameter init, matching nn.Parameter(torch.ones/zeros(features))
    alpha = jnp.ones((hidden,), dtype=jnp.float32)
    bias = jnp.zeros((hidden,), dtype=jnp.float32)

    out = layer_normalization(x, alpha, bias, eps=1e-6)
    out = jax.block_until_ready(out)

    ref = reference_layernorm(x, alpha, bias, eps=1e-6)
    assert out.shape == (batch, seq_len, hidden)
    assert jnp.allclose(out, ref, atol=1e-5, rtol=1e-5), "mismatch vs reference"

    print("KERNEL_OK")
</pallas_src>

<mosaic_0001>
module attributes {stable_mosaic.version = 11 : i64} {
  func.func @_layernorm_kernel(%arg0: i32, %arg1: memref<16x32xf32, #tpu.memory_space<vmem>>, %arg2: memref<1x32xf32, #tpu.memory_space<vmem>>, %arg3: memref<1x32xf32, #tpu.memory_space<vmem>>, %arg4: memref<16x32xf32, #tpu.memory_space<vmem>>) attributes {dimension_semantics = [#tpu.dimension_semantics<parallel>], iteration_bounds = array<i64: 1>, scalar_prefetch = 0 : i64, scratch_operands = 0 : i64, tpu.core_type = #tpu.core_type<tc>, window_params = [{transform_indices = @transform_0, window_bounds = array<i64: 16, 32>}, {pipeline_mode = #tpu.pipeline_mode<synchronous>, transform_indices = @transform_1, window_bounds = array<i64: 1, 32>}, {pipeline_mode = #tpu.pipeline_mode<synchronous>, transform_indices = @transform_2, window_bounds = array<i64: 1, 32>}, {transform_indices = @transform_3, window_bounds = array<i64: 16, 32>}]} {
    %c0 = arith.constant 0 : index
    %c0_0 = arith.constant 0 : index
    %0 = vector.load %arg1[%c0, %c0_0] : memref<16x32xf32, #tpu.memory_space<vmem>>, vector<16x32xf32>
    %c0_1 = arith.constant 0 : index
    %c0_2 = arith.constant 0 : index
    %1 = vector.load %arg2[%c0_1, %c0_2] : memref<1x32xf32, #tpu.memory_space<vmem>>, vector<1x32xf32>
    %c0_3 = arith.constant 0 : index
    %c0_4 = arith.constant 0 : index
    %2 = vector.load %arg3[%c0_3, %c0_4] : memref<1x32xf32, #tpu.memory_space<vmem>>, vector<1x32xf32>
    %cst = arith.constant dense<0.000000e+00> : vector<16xf32>
    %3 = vector.multi_reduction <add>, %0, %cst [1] : vector<16x32xf32> to vector<16xf32>
    %4 = vector.shape_cast %3 : vector<16xf32> to vector<16x1xf32>
    %cst_5 = arith.constant 3.125000e-02 : f32
    %5 = vector.broadcast %cst_5 : f32 to vector<16x1xf32>
    %6 = arith.mulf %4, %5 : vector<16x1xf32>
    %7 = vector.broadcast %6 : vector<16x1xf32> to vector<16x32xf32>
    %8 = arith.subf %0, %7 : vector<16x32xf32>
    %9 = arith.mulf %8, %8 : vector<16x32xf32>
    %cst_6 = arith.constant dense<0.000000e+00> : vector<16xf32>
    %10 = vector.multi_reduction <add>, %9, %cst_6 [1] : vector<16x32xf32> to vector<16xf32>
    %11 = vector.shape_cast %10 : vector<16xf32> to vector<16x1xf32>
    %cst_7 = arith.constant 3.100000e+01 : f32
    %12 = vector.broadcast %cst_7 : f32 to vector<16x1xf32>
    %13 = arith.divf %11, %12 : vector<16x1xf32>
    %14 = math.sqrt %13 : vector<16x1xf32>
    %cst_8 = arith.constant 9.99999997E-7 : f32
    %15 = vector.broadcast %cst_8 : f32 to vector<16x1xf32>
    %16 = arith.addf %14, %15 : vector<16x1xf32>
    %cst_9 = arith.constant 1.000000e+00 : f32
    %17 = vector.broadcast %cst_9 : f32 to vector<16x1xf32>
    %18 = arith.divf %17, %16 : vector<16x1xf32>
    %19 = vector.broadcast %18 : vector<16x1xf32> to vector<16x32xf32>
    %20 = arith.mulf %8, %19 : vector<16x32xf32>
    %21 = vector.broadcast %1 : vector<1x32xf32> to vector<16x32xf32>
    %22 = arith.mulf %20, %21 : vector<16x32xf32>
    %23 = vector.broadcast %2 : vector<1x32xf32> to vector<16x32xf32>
    %24 = arith.addf %22, %23 : vector<16x32xf32>
    %c0_10 = arith.constant 0 : index
    %c0_11 = arith.constant 0 : index
    %25 = vector.load %arg4[%c0_10, %c0_11] : memref<16x32xf32, #tpu.memory_space<vmem>>, vector<16x32xf32>
    tpu.vector_store %arg4[%c0_10, %c0_11], %24 {strides = array<i32>} : memref<16x32xf32, #tpu.memory_space<vmem>>, vector<16x32xf32>,
    return
  }
  func.func @transform_0(%arg0: i32) -> (i32, i32) {
    %c0_i32 = arith.constant 0 : i32
    %c0_i32_0 = arith.constant 0 : i32
    return %arg0, %c0_i32 : i32, i32
  }
  func.func @transform_1(%arg0: i32) -> (i32, i32) {
    %c0_i32 = arith.constant 0 : i32
    %c0_i32_0 = arith.constant 0 : i32
    %c0_i32_1 = arith.constant 0 : i32
    return %c0_i32, %c0_i32_0 : i32, i32
  }
  func.func @transform_2(%arg0: i32) -> (i32, i32) {
    %c0_i32 = arith.constant 0 : i32
    %c0_i32_0 = arith.constant 0 : i32
    %c0_i32_1 = arith.constant 0 : i32
    return %c0_i32, %c0_i32_0 : i32, i32
  }
  func.func @transform_3(%arg0: i32) -> (i32, i32) {
    %c0_i32 = arith.constant 0 : i32
    %c0_i32_0 = arith.constant 0 : i32
    return %arg0, %c0_i32 : i32, i32
  }
}

</mosaic_0001>

<bundles_post_ra>
// kernel: tpu_custom_call.1
= control target key start
LH: loop header
LB: loop body
LE: loop exit
PB: predicated region body
PF: predicated region fallthrough
CT: control target
= control target key end

     0   :  { %8 = vsyncpa [#allocation3], 0  ;;  %s240_s0 = inlined_call_operand.hbm [shape: f32[16,32], index: 0, kind: input, shape index: {}]   ;;  %s241_s1 = inlined_call_operand.vmem [shape: f32[1,32], index: 1, kind: input, shape index: {}]   ;;  %s242_s2 = inlined_call_operand.vmem [shape: f32[1,32], index: 2, kind: input, shape index: {}]   ;;  %s243_s3 = inlined_call_operand.hbm [shape: f32[16,32], index: 3, kind: output, shape index: {}]  }
   0x1   :  { %9 = vsyncpa [#allocation4], 0  ;;  %s174_s12 = smov [#allocation2]   ;;  %s126_s16 = scalar_lea.hbm %s240_s0, 256 }
   0x2   :  { %s15_s13 = sshll.u32 %s174_s12, 4  ;;  %p127_p0 = scmp.ne.s32.totalorder %s240_s0, %s126_s16  ;;  %s16_s13 = int_to_ptr.vmem [resolvable:$true] %s15_s13 }
   0x3   :  { %p130_p1 = scmp.lt.u32.totalorder %s126_s16, %s240_s0 }
   0x5   :  { %p132_p2 = pnand %p130_p1, %p127_p0 }
   0x7   :  { %135 = shalt.err (!%p132_p2)
}
   0x8   :  { %s136_s21 = scalar_lea.vmem %s16_s13, 256  ;;  %p141_p4 = scmp.lt.s32.totalorder %s16_s13, %s16_s13 }
   0x9   :  { %p137_p3 = scmp.ne.s32.totalorder %s16_s13, %s136_s21  ;;  %p142_p5 = scmp.lt.s32.totalorder %s136_s21, %s136_s21 }
   0xb   :  { %p143_p6 = por %p142_p5, %p141_p4 }
   0xd   :  { %p144_p7 = pnand %p143_p6, %p137_p3 }
   0xf   :  { %147 = shalt.err (!%p144_p7)
}
  0x10   :  { %s175_s22 = smov 128   ;;  %s176_s23 = smov 8  }
  0x11   :  { %21 = dma.hbm_to_vmem [thread:$0]  %s240_s0, 256, %s16_s13, [#allocation3], %s175_s22, %s175_s22, %s176_s23  }
  0x12   :  { %170 = dma.done.wait [#allocation3], 256  }
  0x13   :  { %171 = vsyncadd [#allocation3], 4294967040  ;;  %vm33_vm0 = vcmask 261120   ;;  %v29_v0 = vld [vmem:[#allocation2] sm:$0xff]  ;;  %v30_v1 = vld [vmem:[#allocation2 + $0x8] sm:$0xff]  ;;  %s177_s29 = smov [#allocation5]  }
  0x14   :  { %v34_v2 = vsel %vm33_vm0, %v29_v0, 0.0  ;;  %v37_v3 = vsel %vm33_vm0, %v30_v1, 0.0  ;;  %v112_v31 = vld [vmem:[%s241_s1] ss:$0 sm:$0xff]  ;;  %s100_s30 = sshll.u32 %s177_s29, 4  ;;  %s101_s30 = int_to_ptr.vmem [resolvable:$true] %s100_s30 }
  0x15   :  { %35 = vadd.xlane.f32.xlu0 %v34_v2  ;;  %v113_v33 = vld [vmem:[%s242_s2] ss:$0 sm:$0xff]  ;;  %s148_s4 = scalar_lea.vmem %s101_s30, 256  ;;  %p153_p9 = scmp.lt.s32.totalorder %s101_s30, %s101_s30 }
  0x16   :  { %p149_p8 = scmp.ne.s32.totalorder %s101_s30, %s148_s4  ;;  %p154_p10 = scmp.lt.s32.totalorder %s148_s4, %s148_s4 }
  0x18   :  { %p155_p11 = por %p154_p10, %p153_p9 }
  0x19   :  { %38 = vadd.xlane.f32.xlu0 %v37_v3 }
  0x1a   :  { %p156_p12 = pnand %p155_p11, %p149_p8 }
  0xa2   :  { %v36_v4 = vpop.xlane.xlu0 %35 }
  0xa3   :  { %v40_v5 = vmul.f32 0.03125, %v36_v4 }
  0xa5   :  { %v42_v6 = vsub.f32 %v29_v0, %v40_v5 }
  0xa6   :  { %v39_v7 = vpop.xlane.xlu0 %38 }
  0xa7   :  { %v41_v8 = vmul.f32 0.03125, %v39_v7  ;;  %v44_v9 = vmul.f32 %v42_v6, %v42_v6 }
  0xa9   :  { %v43_v10 = vsub.f32 %v30_v1, %v41_v8  ;;  %v46_v11 = vsel %vm33_vm0, %v44_v9, 0.0 }
  0xaa   :  { %47 = vadd.xlane.f32.xlu1 %v46_v11 }
  0xab   :  { %v45_v12 = vmul.f32 %v43_v10, %v43_v10 }
  0xad   :  { %v49_v13 = vsel %vm33_vm0, %v45_v12, 0.0 }
  0xae   :  { %50 = vadd.xlane.f32.xlu1 %v49_v13 }
 0x137   :  { %v48_v14 = vpop.xlane.xlu1 %47 }
 0x138   :  { %v53_v15 = vmul.f32 0.032258064, %v48_v14 }
 0x13a   :  { %118 = vrsqrt.f32 %v53_v15  ;;  %vm57_vm1 = vcmp.eq.f32.partialorder %v53_v15, inf  ;;  %v60_v20 = vand.u32 2147483648, %v53_v15  ;;  %vm59_vm2 = vcmp.eq.f32.partialorder %v53_v15, 0.0 }
 0x13b   :  { %v51_v16 = vpop.xlane.xlu1 %50 }
 0x13c   :  { %v54_v17 = vmul.f32 0.032258064, %v51_v16 }
 0x13e   :  { %120 = vrsqrt.f32 %v54_v17  ;;  %vm64_vm3 = vcmp.eq.f32.partialorder %v54_v17, inf  ;;  %v67_v26 = vand.u32 2147483648, %v54_v17  ;;  %vm66_vm4 = vcmp.eq.f32.partialorder %v54_v17, 0.0 }
 0x144   :  { %v119_v18 = vpop.eup %118 }
 0x145   :  { %v56_v19 = vmul.f32 %v119_v18, %v53_v15 }
 0x147   :  { %v58_v21 = vsel %vm57_vm1, %v53_v15, %v56_v19 }
 0x148   :  { %v121_v22 = vpop.eup %120  ;;  %v61_v23 = vsel %vm59_vm2, %v60_v20, %v58_v21 }
 0x149   :  { %v69_v24 = vadd.f32 1e-06, %v61_v23  ;;  %v63_v25 = vmul.f32 %v121_v22, %v54_v17 }
 0x14b   :  { %122 = vrcp.f32 %v69_v24  ;;  %v65_v27 = vsel %vm64_vm3, %v54_v17, %v63_v25 }
 0x14c   :  { %v68_v28 = vsel %vm66_vm4, %v67_v26, %v65_v27 }
 0x14d   :  { %v70_v29 = vadd.f32 1e-06, %v68_v28 }
 0x14f   :  { %124 = vrcp.f32 %v70_v29 }
 0x155   :  { %v123_v30 = vpop.eup %122 }
 0x156   :  { %v75_v32 = vmul.f32 %v123_v30, %v42_v6 }
 0x158   :  { %v83_v34 = vmul.f32 %v112_v31, %v75_v32 }
 0x159   :  { %v125_v35 = vpop.eup %124 }
 0x15a   :  { %v76_v36 = vmul.f32 %v125_v35, %v43_v10  ;;  %v91_v37 = vadd.f32 %v113_v33, %v83_v34 }
 0x15c   :  { %v84_v38 = vmul.f32 %v112_v31, %v76_v36  ;;  %93 = vst.msk [vmem:[#allocation5] sm:$0xff] %vm33_vm0, %v91_v37 }
 0x15e   :  { %v92_v39 = vadd.f32 %v113_v33, %v84_v38 }
 0x160   :  { %94 = vst.msk [vmem:[#allocation5 + $0x8] sm:$0xff] %vm33_vm0, %v92_v39 }
 0x161   :  { %159 = shalt.err (!%p156_p12)
}
 0x162   :  { %s160_s5 = scalar_lea.hbm %s243_s3, 256 }
 0x163   :  { %p161_p13 = scmp.ne.s32.totalorder %s243_s3, %s160_s5  ;;  %p164_p0 = scmp.lt.u32.totalorder %s160_s5, %s243_s3 }
 0x165   :  { %p166_p1 = pnand %p164_p0, %p161_p13 }
 0x167   :  { %169 = shalt.err (!%p166_p1)
}
 0x168   :  { %106 = dma.vmem_to_hbm [thread:$0]  %s101_s30, 256, %s243_s3, [#allocation4], %s175_s22, %s175_s22, %s176_s23  }
 0x169   :  { %172 = dma.done.wait [#allocation4], 256  }
 0x16a   :  { %173 = vsyncadd [#allocation4], 4294967040 }
 0x16b   :  { %110 = vsyncpa [#allocation3], 1 }
 0x16c   :  { %111 = vsyncpa [#allocation4], 1 }

</bundles_post_ra>
